<compile_context>
chip_gen: v6e
topology: v6e:2x2x1
jax: 0.10.0
libtpu: 0.0.40
codegen_flags: <defaults>
</compile_context>

<pallas_src>
import jax
import jax.numpy as jnp
from jax.experimental import pallas as pl
from jax.experimental.pallas import tpu as pltpu


def _transpose_hw_kernel(x_ref, o_ref):
    # x_ref: (Cb, H, W) VMEM tile, o_ref: (Cb, W, H) VMEM tile.
    cb = x_ref.shape[0]

    def body(c, carry):
        # Dynamic first-axis index + 2-D XLU transpose of one (H, W) plane.
        o_ref[c] = jnp.transpose(x_ref[c])
        return carry

    jax.lax.fori_loop(0, cb, body, 0, unroll=cb <= 8)


def _pick_channel_block(C, per_channel_vmem_bytes, budget_bytes=12 << 20):
    """Largest Cb dividing C whose double-buffered in+out tiles fit the budget."""
    best = 1
    for cand in range(1, C + 1):
        if C % cand == 0 and 2 * cand * per_channel_vmem_bytes <= budget_bytes:
            best = cand
    return best


def flatten_forward(x):
    """Equivalent of Flatten.forward for an NCHW input array."""
    N, C, H, W = x.shape
    itemsize = jnp.dtype(x.dtype).itemsize

    # Lane-padded VMEM footprint of one channel's (H, W) input tile plus its
    # (W, H) output tile (minor dim pads to 128 lanes, second-minor to 8).
    per_channel_vmem = (
        pl.cdiv(H, 8) * 8 * pl.cdiv(W, 128) * 128
        + pl.cdiv(W, 8) * 8 * pl.cdiv(H, 128) * 128
    ) * itemsize
    cb = _pick_channel_block(C, per_channel_vmem)
    num_groups = C // cb

    x_t = pl.pallas_call(
        _transpose_hw_kernel,
        out_shape=jax.ShapeDtypeStruct((N, C, W, H), x.dtype),
        grid_spec=pltpu.PrefetchScalarGridSpec(
            num_scalar_prefetch=0,
            grid=(N, num_groups),
            in_specs=[pl.BlockSpec((pl.Squeezed(), cb, H, W),
                                   lambda n, g: (n, g, 0, 0))],
            out_specs=pl.BlockSpec((pl.Squeezed(), cb, W, H),
                                   lambda n, g: (n, g, 0, 0)),
        ),
        compiler_params=pltpu.CompilerParams(
            dimension_semantics=("parallel", "parallel")),
        cost_estimate=pl.CostEstimate(
            flops=0,
            transcendentals=0,
            bytes_accessed=2 * N * C * H * W * itemsize),
    )(x)

    # .view(N, -1) on the now-contiguous (N, C, W, H) tensor == free metadata
    # reshape (the kernel already wrote dense, contiguous HBM per block).
    return x_t.reshape(N, -1)


if __name__ == "__main__":
    key = jax.random.PRNGKey(0)
    N, C, H, W = 2, 4, 16, 16
    x = jax.random.normal(key, (N, C, H, W), dtype=jnp.float32)

    flatten = jax.jit(flatten_forward)
    out = jax.block_until_ready(flatten(x))

    # Reference semantics (pure JAX) to sanity-check the kernel.
    ref = jnp.transpose(x, (0, 1, 3, 2)).reshape(N, -1)
    assert out.shape == (N, C * W * H), out.shape
    assert out.dtype == x.dtype
    assert jnp.array_equal(out, ref), "mismatch vs reference"

    print("KERNEL_OK")
</pallas_src>

<mosaic_0001>
module attributes {stable_mosaic.version = 11 : i64} {
  func.func @_transpose_hw_kernel(%arg0: i32, %arg1: i32, %arg2: memref<1x4x16x16xf32, #tpu.memory_space<vmem>>, %arg3: memref<1x4x16x16xf32, #tpu.memory_space<vmem>>) attributes {dimension_semantics = [#tpu.dimension_semantics<parallel>, #tpu.dimension_semantics<parallel>], iteration_bounds = array<i64: 2, 1>, scalar_prefetch = 0 : i64, scratch_operands = 0 : i64, tpu.core_type = #tpu.core_type<tc>, window_params = [{transform_indices = @transform_0, window_bounds = array<i64: 1, 4, 16, 16>}, {transform_indices = @transform_1, window_bounds = array<i64: 1, 4, 16, 16>}]} {
    %c0_i32 = arith.constant 0 : i32
    %c0 = arith.constant 0 : index
    %0 = arith.index_cast %c0_i32 : i32 to index
    %c0_0 = arith.constant 0 : index
    %c0_1 = arith.constant 0 : index
    %1 = vector.load %arg2[%c0, %0, %c0_0, %c0_1] : memref<1x4x16x16xf32, #tpu.memory_space<vmem>>, vector<1x1x16x16xf32>
    %2 = vector.shape_cast %1 : vector<1x1x16x16xf32> to vector<16x16xf32>
    %3 = tpu.transpose %2, [1, 0] : vector<16x16xf32> -> vector<16x16xf32>
    %c0_2 = arith.constant 0 : index
    %4 = arith.index_cast %c0_i32 : i32 to index
    %c0_3 = arith.constant 0 : index
    %c0_4 = arith.constant 0 : index
    %5 = vector.load %arg3[%c0_2, %4, %c0_3, %c0_4] : memref<1x4x16x16xf32, #tpu.memory_space<vmem>>, vector<1x1x16x16xf32>
    %6 = vector.shape_cast %5 : vector<1x1x16x16xf32> to vector<16x16xf32>
    %7 = vector.shape_cast %3 : vector<16x16xf32> to vector<1x1x16x16xf32>
    tpu.vector_store %arg3[%c0_2, %4, %c0_3, %c0_4], %7 {strides = array<i32>} : memref<1x4x16x16xf32, #tpu.memory_space<vmem>>, vector<1x1x16x16xf32>,
    %c1_i32 = arith.constant 1 : i32
    %c0_5 = arith.constant 0 : index
    %8 = arith.index_cast %c1_i32 : i32 to index
    %c0_6 = arith.constant 0 : index
    %c0_7 = arith.constant 0 : index
    %9 = vector.load %arg2[%c0_5, %8, %c0_6, %c0_7] : memref<1x4x16x16xf32, #tpu.memory_space<vmem>>, vector<1x1x16x16xf32>
    %10 = vector.shape_cast %9 : vector<1x1x16x16xf32> to vector<16x16xf32>
    %11 = tpu.transpose %10, [1, 0] : vector<16x16xf32> -> vector<16x16xf32>
    %c0_8 = arith.constant 0 : index
    %12 = arith.index_cast %c1_i32 : i32 to index
    %c0_9 = arith.constant 0 : index
    %c0_10 = arith.constant 0 : index
    %13 = vector.load %arg3[%c0_8, %12, %c0_9, %c0_10] : memref<1x4x16x16xf32, #tpu.memory_space<vmem>>, vector<1x1x16x16xf32>
    %14 = vector.shape_cast %13 : vector<1x1x16x16xf32> to vector<16x16xf32>
    %15 = vector.shape_cast %11 : vector<16x16xf32> to vector<1x1x16x16xf32>
    tpu.vector_store %arg3[%c0_8, %12, %c0_9, %c0_10], %15 {strides = array<i32>} : memref<1x4x16x16xf32, #tpu.memory_space<vmem>>, vector<1x1x16x16xf32>,
    %c2_i32 = arith.constant 2 : i32
    %c0_11 = arith.constant 0 : index
    %16 = arith.index_cast %c2_i32 : i32 to index
    %c0_12 = arith.constant 0 : index
    %c0_13 = arith.constant 0 : index
    %17 = vector.load %arg2[%c0_11, %16, %c0_12, %c0_13] : memref<1x4x16x16xf32, #tpu.memory_space<vmem>>, vector<1x1x16x16xf32>
    %18 = vector.shape_cast %17 : vector<1x1x16x16xf32> to vector<16x16xf32>
    %19 = tpu.transpose %18, [1, 0] : vector<16x16xf32> -> vector<16x16xf32>
    %c0_14 = arith.constant 0 : index
    %20 = arith.index_cast %c2_i32 : i32 to index
    %c0_15 = arith.constant 0 : index
    %c0_16 = arith.constant 0 : index
    %21 = vector.load %arg3[%c0_14, %20, %c0_15, %c0_16] : memref<1x4x16x16xf32, #tpu.memory_space<vmem>>, vector<1x1x16x16xf32>
    %22 = vector.shape_cast %21 : vector<1x1x16x16xf32> to vector<16x16xf32>
    %23 = vector.shape_cast %19 : vector<16x16xf32> to vector<1x1x16x16xf32>
    tpu.vector_store %arg3[%c0_14, %20, %c0_15, %c0_16], %23 {strides = array<i32>} : memref<1x4x16x16xf32, #tpu.memory_space<vmem>>, vector<1x1x16x16xf32>,
    %c3_i32 = arith.constant 3 : i32
    %c0_17 = arith.constant 0 : index
    %24 = arith.index_cast %c3_i32 : i32 to index
    %c0_18 = arith.constant 0 : index
    %c0_19 = arith.constant 0 : index
    %25 = vector.load %arg2[%c0_17, %24, %c0_18, %c0_19] : memref<1x4x16x16xf32, #tpu.memory_space<vmem>>, vector<1x1x16x16xf32>
    %26 = vector.shape_cast %25 : vector<1x1x16x16xf32> to vector<16x16xf32>
    %27 = tpu.transpose %26, [1, 0] : vector<16x16xf32> -> vector<16x16xf32>
    %c0_20 = arith.constant 0 : index
    %28 = arith.index_cast %c3_i32 : i32 to index
    %c0_21 = arith.constant 0 : index
    %c0_22 = arith.constant 0 : index
    %29 = vector.load %arg3[%c0_20, %28, %c0_21, %c0_22] : memref<1x4x16x16xf32, #tpu.memory_space<vmem>>, vector<1x1x16x16xf32>
    %30 = vector.shape_cast %29 : vector<1x1x16x16xf32> to vector<16x16xf32>
    %31 = vector.shape_cast %27 : vector<16x16xf32> to vector<1x1x16x16xf32>
    tpu.vector_store %arg3[%c0_20, %28, %c0_21, %c0_22], %31 {strides = array<i32>} : memref<1x4x16x16xf32, #tpu.memory_space<vmem>>, vector<1x1x16x16xf32>,
    %c4_i32 = arith.constant 4 : i32
    return
  }
  func.func @transform_0(%arg0: i32, %arg1: i32) -> (i32, i32, i32, i32) {
    %c0_i32 = arith.constant 0 : i32
    %c0_i32_0 = arith.constant 0 : i32
    %c0_i32_1 = arith.constant 0 : i32
    return %arg0, %arg1, %c0_i32, %c0_i32_0 : i32, i32, i32, i32
  }
  func.func @transform_1(%arg0: i32, %arg1: i32) -> (i32, i32, i32, i32) {
    %c0_i32 = arith.constant 0 : i32
    %c0_i32_0 = arith.constant 0 : i32
    %c0_i32_1 = arith.constant 0 : i32
    return %arg0, %arg1, %c0_i32, %c0_i32_0 : i32, i32, i32, i32
  }
}

</mosaic_0001>

<bundles_post_ra>
// kernel: flatten_forward.1
= control target key start
LH: loop header
LB: loop body
LE: loop exit
PB: predicated region body
PF: predicated region fallthrough
CT: control target
= control target key end

     0   :  { %6 = vsyncpa [#allocation3], 0  ;;  %s702_s0 = inlined_call_operand.hbm [shape: f32[2,4,16,16], index: 0, kind: input, shape index: {}]   ;;  %s703_s1 = inlined_call_operand.vmem [shape: f32[2,4,16,16], index: 1, kind: output, shape index: {}]  }
   0x1   :  { %8 = vsyncpa [#allocation3 + $0x1], 0  ;;  %s598_s6 = smov 0   ;;  %s600_s7 = smov 0  }
   0x2   :  { %s602_s8 = smov 0   ;;  %s604_s9 = smov 0  }
   0x3   :  { %s606_s10 = smov 0   ;;  %s608_s11 = smov 0  }
   0x4 LB: > { %s420_s12 = sadd.s32 4294967295, %s583_s11   ;;  %s26_s13 = sadd.s32 1, %s579_s10  ;;  %s583_s11 = sphi %s608_s11, %s14_s11   ;;  %s579_s10 = sphi %s606_s10, %s711_s10   ;;  %s575_s9 = sphi %s604_s9, %s710_s9   ;;  %s571_s8 = sphi %s602_s8, %s709_s8   ;;  %s567_s7 = sphi %s600_s7, %s708_s7   ;;  %s563_s6 = sphi %s598_s6, %s707_s6  }
   0x5   : > { %p28_p0 = scmp.ge.s32.totalorder %s26_s13, 2  ;;  %s35_s14 = sadd.s32 1, %s571_s8 }
   0x6   : > { %p42_p1 = scmp.ne.s32.totalorder %s571_s8, %s567_s7  ;;  %p43_p2 = scmp.eq.s32.totalorder %s583_s11, 0 }
   0x7   : > { %s713_s13 = smov (%p28_p0, %s26_s13), 0  ;;  %p48_p4 = scmp.ne.s32.totalorder %s567_s7, %s563_s6 }
   0x8   : > { %p634_p3 = por %p43_p2, %p42_p1  ;;  %s30_s16 = ssub.s32 %s579_s10, %s713_s13 }
   0x9   : > { %p49_p5 = scmp.eq.s32.totalorder %s420_s12, 0  ;;  %p33_p6 = scmp.eq.s32.totalorder %s30_s16, 0 }
   0xa   : > { %p453_p8 = scmp.lt.s32.totalorder %s583_s11, 2  ;;  %s100_s19 = sand.u32 1, %s571_s8  }
   0xb   : > { %p641_p7 = por %p49_p5, %p48_p4  ;;  %s445_s20 = sshll.u32 %s579_s10, 10 }
   0xc   : > { %s647_s18 = scalar_select %p33_p6, %s571_s8, %s35_s14  }
   0xd   : > { %s424_s21 = sshll.u32 %s100_s19, 6  ;;  %s113_s24 = scalar_lea.hbm %s702_s0, %s445_s20 }
   0xe   : > { %s104_s25 = scalar_lea.vmem [#allocation2], %s424_s21  ;;  %p656_p9 = pnand %p453_p8, %p634_p3 }
   0xf   : > { %s114_s26 = sshll.u32 %s104_s25, 4  ;;  %s101_s28 = scalar_lea.sflag [#allocation3], %s100_s19  ;;  %s115_s26 = int_to_ptr.vmem [resolvable:$true] %s114_s26 }
  0x10   : > { %p507_p10 = pneg %p656_p9  ;;  %s518_s29 = scalar_lea.vmem %s115_s26, 1024 }
  0x11   : > { %p519_p11 = scmp.ne.s32.totalorder %s115_s26, %s518_s29  ;;  %s585_s30 = smov [#allocation2]  }
  0x12   : > { %s523_s2 = sshll.u32 %s585_s30, 4  ;;  %s524_s2 = int_to_ptr.vmem [resolvable:$false] %s523_s2 }
  0x13   : > { %p521_p12 = pnand %p519_p11, %p507_p10  ;;  %s525_s3 = scalar_lea.vmem %s524_s2, 2048 }
  0x14   : > { %p526_p0 = scmp.lt.s32.totalorder %s115_s26, %s524_s2  ;;  %p527_p1 = scmp.lt.s32.totalorder %s525_s3, %s518_s29 }
  0x15   : > { %p522_p13 = pneg %p521_p12 }
  0x16   : > { %p528_p2 = por %p527_p1, %p526_p0 }
  0x18   : > { %p529_p3 = pnand %p528_p2, %p522_p13 }
  0x1a   : > { %532 = shalt.err (!%p529_p3)
}
  0x1b   : > { %s586_s4 = smov 128   ;;  %s587_s5 = smov 8  }
  0x1c   : > { %452 = dma.hbm_to_vmem [thread:$0]  (!%p656_p9), %s113_s24, 1024, %s115_s26, %s101_s28, %s586_s4, %s586_s4, %s587_s5  }
  0x1d   : > { %p427_p4 = scmp.ge.s32.totalorder %s583_s11, 1  ;;  %p122_p5 = scmp.lt.s32.totalorder %s583_s11, 3 }
  0x1f   : > { %p123_p6 = pnand %p427_p4, %p122_p5 }
  0x20   : > { %s128_s6 = sand.u32 (!%p123_p6), 1, %s567_s7  }
  0x21   : > { %126 = sbr.rel (%p123_p6) target bundleno = 178 (0xb2), region = 24  ;;  %s428_s12 = sshll.u32 (!%p123_p6), %s128_s6, 6 }
  0x22   : > { %s129_s14 = scalar_lea.sflag (!%p123_p6), [#allocation3], %s128_s6  ;;  %s132_s15 = scalar_lea.vmem (!%p123_p6), [#allocation2], %s428_s12 }
  0x26   : > { %558 = dma.done.wait (%p641_p7), %s129_s14, 1024  }
  0x27   : > { %560 = vsyncadd (%p641_p7), %s129_s14, 4294966272  ;;  %v431_v0 = vld [vmem:[%s132_s15 + $0x10] sm:$0xff]  ;;  %v168_v1 = vld [vmem:[%s132_s15] sm:$0xff]  ;;  %p158_p8 = scmp.lt.s32.totalorder %s575_s9, 1  ;;  %vm202_vm0 = vcmask 130048  }
  0x28   : > { %208 = vxpose.xlu1.b32.start [1/2] (short) (narrow) %v431_v0, 16  ;;  %170 = vxpose.xlu0.b32.start [1/2] (short) (narrow) %v168_v1, 16  ;;  %v432_v2 = vld [vmem:[%s132_s15 + $0x18] sm:$0xff]  ;;  %v169_v3 = vld [vmem:[%s132_s15 + $0x8] sm:$0xff]  ;;  %v439_v4 = vld [vmem:[%s132_s15 + $0x30] sm:$0xff] }
  0x29   : > { %v435_v5 = vld [vmem:[%s132_s15 + $0x20] sm:$0xff]  ;;  %v440_v6 = vld [vmem:[%s132_s15 + $0x38] sm:$0xff]  ;;  %v436_v7 = vld [vmem:[%s132_s15 + $0x28] sm:$0xff]  ;;  %s715_s9 = smov (!%p158_p8, %s575_s9), 1 }
  0x2a   : > { %s446_s16 = sshll.u32 %s715_s9, 6 }
  0x2b   : > { %s166_s20 = scalar_lea.vmem %s703_s1, %s446_s16 }
  0x2c   : > { %209 = vxpose.xlu1.b32.end [2/2] (short) (narrow) %v432_v2, 16  ;;  %171 = vxpose.xlu0.b32.end [2/2] (short) (narrow) %v169_v3, 16 }
  0x30   : > { %284 = vxpose.xlu1.b32.start [1/2] (short) (narrow) %v439_v4, 16  ;;  %246 = vxpose.xlu0.b32.start [1/2] (short) (narrow) %v435_v5, 16 }
  0x34   : > { %285 = vxpose.xlu1.b32.end [2/2] (short) (narrow) %v440_v6, 16  ;;  %247 = vxpose.xlu0.b32.end [2/2] (short) (narrow) %v436_v7, 16 }
  0xa4   : > { %v224_v8 = vpop.trf.xlu1  ;;  %v186_v9 = vpop.trf.xlu0 }
  0xa5   : > { %433 = vst.msk [vmem:[%s166_s20 + $0x10] sm:$0xff] %vm202_vm0, %v224_v8  ;;  %203 = vst.msk [vmem:[%s166_s20] sm:$0xff] %vm202_vm0, %v186_v9 }
  0xa8   : > { %v225_v10 = vpop.trf.xlu1  ;;  %v187_v11 = vpop.trf.xlu0 }
  0xa9   : > { %434 = vst.msk [vmem:[%s166_s20 + $0x18] sm:$0xff] %vm202_vm0, %v225_v10  ;;  %204 = vst.msk [vmem:[%s166_s20 + $0x8] sm:$0xff] %vm202_vm0, %v187_v11 }
  0xac   : > { %v300_v12 = vpop.trf.xlu1  ;;  %v262_v13 = vpop.trf.xlu0 }
  0xad   : > { %441 = vst.msk [vmem:[%s166_s20 + $0x30] sm:$0xff] %vm202_vm0, %v300_v12  ;;  %437 = vst.msk [vmem:[%s166_s20 + $0x20] sm:$0xff] %vm202_vm0, %v262_v13 }
  0xb0   : > { %v301_v14 = vpop.trf.xlu1  ;;  %v263_v15 = vpop.trf.xlu0 }
  0xb1   : > { %442 = vst.msk [vmem:[%s166_s20 + $0x38] sm:$0xff] %vm202_vm0, %v301_v14  ;;  %438 = vst.msk [vmem:[%s166_s20 + $0x28] sm:$0xff] %vm202_vm0, %v263_v15 }
  0xb2 PF: > { %s14_s11 = sadd.s32 1, %s583_s11   ;;  %s707_s6 = smov %s567_s7 }
  0xb3   : > { %p11_p7 = scmp.ge.s32.totalorder %s14_s11, 4   ;;  %s708_s7 = smov %s571_s8 }
  0xb4   : > { %s709_s8 = smov %s647_s18  ;;  %s710_s9 = smov %s579_s10 }
  0xb5   : > { %s711_s10 = smov %s713_s13  ;;  %13 = sbr.rel (!%p11_p7) target bundleno = 4 (0x4), region = 70 }
  0xba   :  { %351 = vsyncpa [#allocation3], 1 }
  0xbb   :  { %353 = vsyncpa [#allocation3 + $0x1], 1 }

</bundles_post_ra>
